<compile_context>
chip_gen: v6e
topology: v6e:2x2x1
jax: 0.10.0
libtpu: 0.0.40
codegen_flags: <defaults>
</compile_context>

<pallas_src>
import functools

import jax
import jax.numpy as jnp
from jax.experimental import pallas as pl
from jax.experimental.pallas import tpu as pltpu


def _context_matmul_kernel(x_ref, wt_ref, out_ref):
    # x_ref  : VMEM (TM, D)  gathered current-node embeddings (batch tile)
    # wt_ref : VMEM (D, D)   weight, already transposed to (in_features, out_features)
    # out_ref: VMEM (TM, D)
    out_ref[...] = jnp.dot(
        x_ref[...], wt_ref[...], preferred_element_type=jnp.float32
    ).astype(out_ref.dtype)


def _round_up(x, m):
    return (x + m - 1) // m * m


@functools.partial(jax.jit, static_argnames=("tm",))
def mdcpdp_context(embeddings, current_node, weight, *, tm=256):
    """MDCPDPContext forward.

    embeddings  : (B, N, D) node embeddings
    current_node: (B,) integer indices into the node axis
    weight      : (D, D) nn.Linear weight (out_features, in_features), no bias

    Returns (B, D) = embeddings[b, current_node[b]] @ weight.T
    """
    B, N, D = embeddings.shape
    assert weight.shape == (D, D)
    current_node = current_node.reshape(B).astype(jnp.int32)

    # (1) Gather current-node rows in the wrapper (tiny XLA gather); the kernel
    #     then runs dense MXU-shaped matmuls over batch tiles.
    gathered = jnp.take_along_axis(
        embeddings, current_node[:, None, None], axis=1
    )[:, 0, :]                                             # (B, D)

    # (2) Hoist the weight transpose out of the kernel (one-time op).
    wt = weight.T                                          # (D_in, D_out)

    # (3) Sublane-dense batch tiles: pad B to the sublane packing for the
    #     dtype, then tile by TM (capped at `tm`, default 256 = v6e/v7x MXU rows).
    itemsize = jnp.dtype(embeddings.dtype).itemsize
    sublane = max(8, 32 // itemsize)                       # 8 f32, 16 bf16, 32 int8
    b_pad = _round_up(B, sublane)
    tile_m = min(tm, b_pad)
    b_pad = _round_up(b_pad, tile_m)
    if b_pad != B:
        gathered = jnp.pad(gathered, ((0, b_pad - B), (0, 0)))

    grid = (b_pad // tile_m,)

    out_padded = pl.pallas_call(
        _context_matmul_kernel,
        out_shape=jax.ShapeDtypeStruct((b_pad, D), embeddings.dtype),
        grid=grid,
        in_specs=[
            pl.BlockSpec((tile_m, D), lambda i: (i, 0)),
            pl.BlockSpec((D, D), lambda i: (0, 0)),        # weight resident across grid
        ],
        out_specs=pl.BlockSpec((tile_m, D), lambda i: (i, 0)),
        compiler_params=pltpu.CompilerParams(
            dimension_semantics=("parallel",),             # independent batch tiles
        ),
    )(gathered, wt)

    return out_padded[:B]


if __name__ == "__main__":
    key = jax.random.PRNGKey(0)
    B, N, D = 2, 8, 128   # batch, num_nodes, embed_dim

    k_emb, k_w, k_idx = jax.random.split(key, 3)
    embeddings = jax.random.normal(k_emb, (B, N, D), dtype=jnp.float32)
    # Deterministic Linear weight (out_features, in_features), no bias.
    weight = (jax.random.uniform(k_w, (D, D), dtype=jnp.float32) - 0.5) * (
        2.0 / jnp.sqrt(D)
    )
    current_node = jax.random.randint(k_idx, (B,), 0, N, dtype=jnp.int32)

    out = mdcpdp_context(embeddings, current_node, weight)
    out = jax.block_until_ready(out)

    # Pure-JAX reference check.
    ref = embeddings[jnp.arange(B), current_node] @ weight.T
    assert out.shape == (B, D)
    assert jnp.allclose(out, ref, atol=1e-5, rtol=1e-5)

    print("KERNEL_OK")
</pallas_src>

<mosaic_0001>
module attributes {stable_mosaic.version = 11 : i64} {
  func.func @_context_matmul_kernel(%arg0: i32, %arg1: memref<8x128xf32, #tpu.memory_space<vmem>>, %arg2: memref<128x128xf32, #tpu.memory_space<vmem>>, %arg3: memref<8x128xf32, #tpu.memory_space<vmem>>) attributes {dimension_semantics = [#tpu.dimension_semantics<parallel>], iteration_bounds = array<i64: 1>, scalar_prefetch = 0 : i64, scratch_operands = 0 : i64, tpu.core_type = #tpu.core_type<tc>, window_params = [{transform_indices = @transform_0, window_bounds = array<i64: 8, 128>}, {pipeline_mode = #tpu.pipeline_mode<synchronous>, transform_indices = @transform_1, window_bounds = array<i64: 128, 128>}, {transform_indices = @transform_2, window_bounds = array<i64: 8, 128>}]} {
    %c0 = arith.constant 0 : index
    %c0_0 = arith.constant 0 : index
    %0 = vector.load %arg1[%c0, %c0_0] : memref<8x128xf32, #tpu.memory_space<vmem>>, vector<8x128xf32>
    %c0_1 = arith.constant 0 : index
    %c0_2 = arith.constant 0 : index
    %1 = vector.load %arg2[%c0_1, %c0_2] : memref<128x128xf32, #tpu.memory_space<vmem>>, vector<128x128xf32>
    %cst = arith.constant dense<0.000000e+00> : vector<8x128xf32>
    %2 = tpu.matmul %0, %1, %cst {dimension_numbers = #tpu.dot_dimension_numbers<[1], [0], [0], [1], [0, 0, 1, 1], [], []>} : vector<8x128xf32>, vector<128x128xf32>, vector<8x128xf32> -> vector<8x128xf32>
    %c0_3 = arith.constant 0 : index
    %c0_4 = arith.constant 0 : index
    %3 = vector.load %arg3[%c0_3, %c0_4] : memref<8x128xf32, #tpu.memory_space<vmem>>, vector<8x128xf32>
    tpu.vector_store %arg3[%c0_3, %c0_4], %2 {strides = array<i32>} : memref<8x128xf32, #tpu.memory_space<vmem>>, vector<8x128xf32>,
    return
  }
  func.func @transform_0(%arg0: i32) -> (i32, i32) {
    %c0_i32 = arith.constant 0 : i32
    %c0_i32_0 = arith.constant 0 : i32
    return %arg0, %c0_i32 : i32, i32
  }
  func.func @transform_1(%arg0: i32) -> (i32, i32) {
    %c0_i32 = arith.constant 0 : i32
    %c0_i32_0 = arith.constant 0 : i32
    %c0_i32_1 = arith.constant 0 : i32
    return %c0_i32, %c0_i32_0 : i32, i32
  }
  func.func @transform_2(%arg0: i32) -> (i32, i32) {
    %c0_i32 = arith.constant 0 : i32
    %c0_i32_0 = arith.constant 0 : i32
    return %arg0, %c0_i32 : i32, i32
  }
}

</mosaic_0001>

<bundles_post_ra>
// kernel: mdcpdp_context.1
= control target key start
LH: loop header
LB: loop body
LE: loop exit
PB: predicated region body
PF: predicated region fallthrough
CT: control target
= control target key end

     0   :  { %v157_v0 = vmov 0.0   ;;  %vm158_vm0 = vmmov 0   ;;  %s228_s1 = inlined_call_operand.vmem [shape: f32[128,128], index: 1, kind: input, shape index: {}]   ;;  %s229_s0 = inlined_call_operand.vmem [shape: f32[8,128], index: 0, kind: input, shape index: {}]   ;;  %s230_s2 = inlined_call_operand.vmem [shape: f32[8,128], index: 2, kind: output, shape index: {}]  }
   0x1   :  { %120 = vmatprep.subr.mxu0 %v157_v0  ;;  %v27_v1 = vld [vmem:[%s228_s1 + $0x78] sm:$0xff]  ;;  %v26_v2 = vld [vmem:[%s228_s1 + $0x70] sm:$0xff]  ;;  %152 = vmatprep.mubr.msk.f32.mxu0 %vm158_vm0, %v157_v0  ;;  %v25_v3 = vld [vmem:[%s228_s1 + $0x68] sm:$0xff] }
   0x2   :  { %121 = vmatpush3.msra.mxu0 %v27_v1  ;;  %v24_v4 = vld [vmem:[%s228_s1 + $0x60] sm:$0xff]  ;;  %v23_v5 = vld [vmem:[%s228_s1 + $0x58] sm:$0xff]  ;;  %v22_v6 = vld [vmem:[%s228_s1 + $0x50] sm:$0xff] }
   0x3   :  { %122 = vmatprep.subr.mxu0 %v157_v0  ;;  %v21_v7 = vld [vmem:[%s228_s1 + $0x48] sm:$0xff]  ;;  %v20_v8 = vld [vmem:[%s228_s1 + $0x40] sm:$0xff]  ;;  %v19_v9 = vld [vmem:[%s228_s1 + $0x38] sm:$0xff] }
   0x4   :  { %123 = vmatpush3.msra.mxu0 %v26_v2  ;;  %v18_v10 = vld [vmem:[%s228_s1 + $0x30] sm:$0xff]  ;;  %v17_v11 = vld [vmem:[%s228_s1 + $0x28] sm:$0xff]  ;;  %v16_v12 = vld [vmem:[%s228_s1 + $0x20] sm:$0xff] }
   0x5   :  { %124 = vmatprep.subr.mxu0 %v157_v0  ;;  %v15_v13 = vld [vmem:[%s228_s1 + $0x18] sm:$0xff]  ;;  %v14_v14 = vld [vmem:[%s228_s1 + $0x10] sm:$0xff]  ;;  %v13_v15 = vld [vmem:[%s228_s1 + $0x8] sm:$0xff] }
   0x6   :  { %125 = vmatpush3.msra.mxu0 %v25_v3  ;;  %v12_v16 = vld [vmem:[%s228_s1] sm:$0xff] }
   0x7   :  { %126 = vmatprep.subr.mxu0 %v157_v0  ;;  %v11_v17 = vld [vmem:[%s229_s0] sm:$0xff] }
   0x8   :  { %127 = vmatpush3.msra.mxu0 %v24_v4 }
   0x9   :  { %128 = vmatprep.subr.mxu0 %v157_v0 }
   0xa   :  { %129 = vmatpush3.msra.mxu0 %v23_v5 }
   0xb   :  { %130 = vmatprep.subr.mxu0 %v157_v0 }
   0xc   :  { %131 = vmatpush3.msra.mxu0 %v22_v6 }
   0xd   :  { %132 = vmatprep.subr.mxu0 %v157_v0 }
   0xe   :  { %133 = vmatpush3.msra.mxu0 %v21_v7 }
   0xf   :  { %134 = vmatprep.subr.mxu0 %v157_v0 }
  0x10   :  { %135 = vmatpush3.msra.mxu0 %v20_v8 }
  0x11   :  { %136 = vmatprep.subr.mxu0 %v157_v0 }
  0x12   :  { %137 = vmatpush3.msra.mxu0 %v19_v9 }
  0x13   :  { %138 = vmatprep.subr.mxu0 %v157_v0 }
  0x14   :  { %139 = vmatpush3.msra.mxu0 %v18_v10 }
  0x15   :  { %140 = vmatprep.subr.mxu0 %v157_v0 }
  0x16   :  { %141 = vmatpush3.msra.mxu0 %v17_v11 }
  0x17   :  { %142 = vmatprep.subr.mxu0 %v157_v0 }
  0x18   :  { %143 = vmatpush3.msra.mxu0 %v16_v12 }
  0x19   :  { %144 = vmatprep.subr.mxu0 %v157_v0 }
  0x1a   :  { %145 = vmatpush3.msra.mxu0 %v15_v13 }
  0x1b   :  { %146 = vmatprep.subr.mxu0 %v157_v0 }
  0x1c   :  { %147 = vmatpush3.msra.mxu0 %v14_v14 }
  0x1d   :  { %148 = vmatprep.subr.mxu0 %v157_v0 }
  0x1e   :  { %149 = vmatpush3.msra.mxu0 %v13_v15 }
  0x1f   :  { %150 = vmatprep.subr.mxu0 %v157_v0 }
  0x20   :  { %151 = vmatpush3.msra.mxu0 %v12_v16 }
  0x21   :  { %153 = vmatmul.mubr.f32.vlgmr.msra.gmra.mxu0 %v11_v17 }
  0xe1   :  { %v94_v18 = vpop.f32.mrf.mxu0 }
  0xe2   :  { %98 = vst [vmem:[%s230_s2] sm:$0xff] %v94_v18 }
  0xe3   :  { %v154_v19 = vpop.f32.mrf.mxu0 }

</bundles_post_ra>
